<compile_context>
chip_gen: v7x
topology: tpu7x:2x2x1
jax: 0.10.0
libtpu: 0.0.40
codegen_flags: <defaults>
</compile_context>

<pallas_src>
import functools

import jax
import jax.numpy as jnp
from jax import lax
from jax.experimental import pallas as pl
from jax.experimental.pallas import tpu as pltpu

EPS = 1e-5


def _round_up(a, b):
    return (a + b - 1) // b * b


def prenorm_kernel(x_ref, gamma_ref, beta_ref, w_ref, b_ref, o_ref, *, matmul_dtype):
    # x_ref: (TM, D); gamma/beta: (1, D); w: (D, TH); b: (1, TH); o: (TM, TH)
    x = x_ref[...].astype(jnp.float32)
    d = x.shape[-1]

    # --- LayerNorm over D: single fused pass (sum and sum-of-squares) ---
    s1 = jnp.sum(x, axis=-1, keepdims=True)
    s2 = jnp.sum(x * x, axis=-1, keepdims=True)
    mean = s1 * (1.0 / d)
    var = jnp.maximum(s2 * (1.0 / d) - mean * mean, 0.0)
    inv = lax.rsqrt(var + EPS)  # EUP slot, effectively free next to the matmul
    xn = (x - mean) * inv * gamma_ref[...].astype(jnp.float32) \
         + beta_ref[...].astype(jnp.float32)

    # --- fn(norm(x)): Linear(D -> H) on the MXU, bf16 inputs / f32 accumulate ---
    y = jnp.dot(xn.astype(matmul_dtype), w_ref[...].astype(matmul_dtype),
                preferred_element_type=jnp.float32)
    y = y + b_ref[...].astype(jnp.float32)
    o_ref[...] = y.astype(o_ref.dtype)


def prenorm(x, gamma, beta, w, b, *, tm=None, th=None, matmul_dtype=jnp.bfloat16):
    """x: (B, S, D) -> (B, S, H).  LayerNorm(D) then Linear(D -> H)."""
    B, S, D = x.shape
    H = w.shape[1]
    N = B * S

    # H tile: lane-dense multiple of 128; single tile unless H is very large.
    H128 = _round_up(H, 128)
    if th is None:
        th = H128 if H128 <= 2048 else 512
    th = _round_up(min(th, H128), 128)
    Hp = _round_up(H128, th)            # grid divides exactly

    # Row tile: multiple of 8 sublanes; rows padded so the grid divides exactly.
    if tm is None:
        tm = min(512, _round_up(N, 8))
    tm = _round_up(tm, 8)
    Np = _round_up(N, tm)

    # Zero-pad W/b columns (sliced off afterwards; no-op when already aligned).
    if Hp != H:
        w = jnp.pad(w, ((0, 0), (0, Hp - H)))
        b = jnp.pad(b, ((0, 0), (0, Hp - H)))

    # Zero-pad rows (padded rows are finite under LayerNorm and discarded).
    x2 = x.reshape(N, D)
    if Np != N:
        x2 = jnp.pad(x2, ((0, Np - N), (0, 0)))

    grid = (Np // tm, Hp // th)

    cost = pl.CostEstimate(
        flops=2 * Np * D * Hp,
        transcendentals=Np * grid[1],
        bytes_accessed=4 * (Np * D + D * Hp + Hp + 2 * D + Np * Hp),
    )

    # VMEM budget: double-buffered x/out tiles (+2x headroom) + double-buffered
    # W tile + params; clamped to [32 MiB, 64 MiB] so it stays within v7x
    # physical VMEM while overriding v5e's 16 MiB scoped default.
    est = 2 * (2 * tm * D * 4 + 2 * tm * th * 4) + 2 * D * th * 4 + 4 * (D + th) * 4
    vmem_limit = int(min(max(est, 32 * 1024 * 1024), 64 * 1024 * 1024))

    out = pl.pallas_call(
        functools.partial(prenorm_kernel, matmul_dtype=matmul_dtype),
        out_shape=jax.ShapeDtypeStruct((Np, Hp), x.dtype),
        grid_spec=pltpu.PrefetchScalarGridSpec(
            num_scalar_prefetch=0,
            grid=grid,
            in_specs=[
                pl.BlockSpec((tm, D), lambda i, j: (i, 0)),   # x rows: streamed
                pl.BlockSpec((1, D), lambda i, j: (0, 0)),    # gamma: resident
                pl.BlockSpec((1, D), lambda i, j: (0, 0)),    # beta:  resident
                pl.BlockSpec((D, th), lambda i, j: (0, j)),   # W: resident per H-tile
                pl.BlockSpec((1, th), lambda i, j: (0, j)),   # bias
            ],
            out_specs=pl.BlockSpec((tm, th), lambda i, j: (i, j)),
        ),
        compiler_params=pltpu.CompilerParams(
            dimension_semantics=("parallel", "parallel"),
            vmem_limit_bytes=vmem_limit,
        ),
        cost_estimate=cost,
    )(x2, gamma, beta, w, b)

    return out[:N, :H].reshape(B, S, H)


def prenorm_reference(x, gamma, beta, w, b):
    mean = jnp.mean(x, axis=-1, keepdims=True)
    var = jnp.mean((x - mean) ** 2, axis=-1, keepdims=True)
    xn = (x - mean) * lax.rsqrt(var + EPS) * gamma[0] + beta[0]
    return jnp.einsum("bsd,dh->bsh", xn, w) + b[0]


if __name__ == "__main__":
    B, S, D, H = 2, 8, 32, 32

    key = jax.random.PRNGKey(0)
    kx, kw = jax.random.split(key)

    x = jax.random.normal(kx, (B, S, D), dtype=jnp.float32)

    # nn.LayerNorm(dim) defaults: weight=1, bias=0
    gamma = jnp.ones((1, D), dtype=jnp.float32)
    beta = jnp.zeros((1, D), dtype=jnp.float32)
    # fn = Linear(D, H), deterministic init
    w = jax.random.normal(kw, (D, H), dtype=jnp.float32) * 0.02
    b = jnp.zeros((1, H), dtype=jnp.float32)

    y = prenorm(x, gamma, beta, w, b)
    jax.block_until_ready(y)

    y_ref = prenorm_reference(x, gamma, beta, w, b)
    # bf16 MXU operands (f32 accumulation) -> loosen tolerance vs pure-f32 ref.
    assert jnp.allclose(y, y_ref, atol=2e-2, rtol=2e-2), "mismatch vs reference"

    print("KERNEL_OK")
</pallas_src>

<mosaic_0001>
module attributes {stable_mosaic.version = 11 : i64} {
  func.func @prenorm_kernel(%arg0: i32, %arg1: i32, %arg2: memref<16x32xf32, #tpu.memory_space<vmem>>, %arg3: memref<1x32xf32, #tpu.memory_space<vmem>>, %arg4: memref<1x32xf32, #tpu.memory_space<vmem>>, %arg5: memref<32x128xf32, #tpu.memory_space<vmem>>, %arg6: memref<1x128xf32, #tpu.memory_space<vmem>>, %arg7: memref<16x128xf32, #tpu.memory_space<vmem>>) attributes {dimension_semantics = [#tpu.dimension_semantics<parallel>, #tpu.dimension_semantics<parallel>], iteration_bounds = array<i64: 1, 1>, scalar_prefetch = 0 : i64, scratch_operands = 0 : i64, tpu.core_type = #tpu.core_type<tc>, window_params = [{transform_indices = @transform_0, window_bounds = array<i64: 16, 32>}, {pipeline_mode = #tpu.pipeline_mode<synchronous>, transform_indices = @transform_1, window_bounds = array<i64: 1, 32>}, {pipeline_mode = #tpu.pipeline_mode<synchronous>, transform_indices = @transform_2, window_bounds = array<i64: 1, 32>}, {transform_indices = @transform_3, window_bounds = array<i64: 32, 128>}, {transform_indices = @transform_4, window_bounds = array<i64: 1, 128>}, {transform_indices = @transform_5, window_bounds = array<i64: 16, 128>}]} {
    %c0 = arith.constant 0 : index
    %c0_0 = arith.constant 0 : index
    %0 = vector.load %arg2[%c0, %c0_0] : memref<16x32xf32, #tpu.memory_space<vmem>>, vector<16x32xf32>
    %cst = arith.constant dense<0.000000e+00> : vector<16xf32>
    %1 = vector.multi_reduction <add>, %0, %cst [1] : vector<16x32xf32> to vector<16xf32>
    %2 = vector.shape_cast %1 : vector<16xf32> to vector<16x1xf32>
    %3 = arith.mulf %0, %0 : vector<16x32xf32>
    %cst_1 = arith.constant dense<0.000000e+00> : vector<16xf32>
    %4 = vector.multi_reduction <add>, %3, %cst_1 [1] : vector<16x32xf32> to vector<16xf32>
    %5 = vector.shape_cast %4 : vector<16xf32> to vector<16x1xf32>
    %cst_2 = arith.constant 3.125000e-02 : f32
    %6 = vector.broadcast %cst_2 : f32 to vector<16x1xf32>
    %7 = arith.mulf %2, %6 : vector<16x1xf32>
    %cst_3 = arith.constant 3.125000e-02 : f32
    %8 = vector.broadcast %cst_3 : f32 to vector<16x1xf32>
    %9 = arith.mulf %5, %8 : vector<16x1xf32>
    %10 = arith.mulf %7, %7 : vector<16x1xf32>
    %11 = arith.subf %9, %10 : vector<16x1xf32>
    %cst_4 = arith.constant 0.000000e+00 : f32
    %12 = vector.broadcast %cst_4 : f32 to vector<16x1xf32>
    %13 = arith.maximumf %11, %12 : vector<16x1xf32>
    %cst_5 = arith.constant 9.99999974E-6 : f32
    %14 = vector.broadcast %cst_5 : f32 to vector<16x1xf32>
    %15 = arith.addf %13, %14 : vector<16x1xf32>
    %16 = math.rsqrt %15 : vector<16x1xf32>
    %17 = vector.broadcast %7 : vector<16x1xf32> to vector<16x32xf32>
    %18 = arith.subf %0, %17 : vector<16x32xf32>
    %19 = vector.broadcast %16 : vector<16x1xf32> to vector<16x32xf32>
    %20 = arith.mulf %18, %19 : vector<16x32xf32>
    %c0_6 = arith.constant 0 : index
    %c0_7 = arith.constant 0 : index
    %21 = vector.load %arg3[%c0_6, %c0_7] : memref<1x32xf32, #tpu.memory_space<vmem>>, vector<1x32xf32>
    %22 = vector.broadcast %21 : vector<1x32xf32> to vector<16x32xf32>
    %23 = arith.mulf %20, %22 : vector<16x32xf32>
    %c0_8 = arith.constant 0 : index
    %c0_9 = arith.constant 0 : index
    %24 = vector.load %arg4[%c0_8, %c0_9] : memref<1x32xf32, #tpu.memory_space<vmem>>, vector<1x32xf32>
    %25 = vector.broadcast %24 : vector<1x32xf32> to vector<16x32xf32>
    %26 = arith.addf %23, %25 : vector<16x32xf32>
    %27 = arith.truncf %26 : vector<16x32xf32> to vector<16x32xbf16>
    %c0_10 = arith.constant 0 : index
    %c0_11 = arith.constant 0 : index
    %28 = vector.load %arg5[%c0_10, %c0_11] : memref<32x128xf32, #tpu.memory_space<vmem>>, vector<32x128xf32>
    %29 = arith.truncf %28 : vector<32x128xf32> to vector<32x128xbf16>
    %cst_12 = arith.constant dense<0.000000e+00> : vector<16x128xf32>
    %30 = tpu.matmul %27, %29, %cst_12 {dimension_numbers = #tpu.dot_dimension_numbers<[1], [0], [0], [1], [0, 0, 1, 1], [], []>} : vector<16x32xbf16>, vector<32x128xbf16>, vector<16x128xf32> -> vector<16x128xf32>
    %c0_13 = arith.constant 0 : index
    %c0_14 = arith.constant 0 : index
    %31 = vector.load %arg6[%c0_13, %c0_14] : memref<1x128xf32, #tpu.memory_space<vmem>>, vector<1x128xf32>
    %32 = vector.broadcast %31 : vector<1x128xf32> to vector<16x128xf32>
    %33 = arith.addf %30, %32 : vector<16x128xf32>
    %c0_15 = arith.constant 0 : index
    %c0_16 = arith.constant 0 : index
    %34 = vector.load %arg7[%c0_15, %c0_16] : memref<16x128xf32, #tpu.memory_space<vmem>>, vector<16x128xf32>
    tpu.vector_store %arg7[%c0_15, %c0_16], %33 {strides = array<i32>} : memref<16x128xf32, #tpu.memory_space<vmem>>, vector<16x128xf32>,
    return
  }
  func.func @transform_0(%arg0: i32, %arg1: i32) -> (i32, i32) {
    %c0_i32 = arith.constant 0 : i32
    %c0_i32_0 = arith.constant 0 : i32
    return %arg0, %c0_i32 : i32, i32
  }
  func.func @transform_1(%arg0: i32, %arg1: i32) -> (i32, i32) {
    %c0_i32 = arith.constant 0 : i32
    %c0_i32_0 = arith.constant 0 : i32
    %c0_i32_1 = arith.constant 0 : i32
    return %c0_i32, %c0_i32_0 : i32, i32
  }
  func.func @transform_2(%arg0: i32, %arg1: i32) -> (i32, i32) {
    %c0_i32 = arith.constant 0 : i32
    %c0_i32_0 = arith.constant 0 : i32
    %c0_i32_1 = arith.constant 0 : i32
    return %c0_i32, %c0_i32_0 : i32, i32
  }
  func.func @transform_3(%arg0: i32, %arg1: i32) -> (i32, i32) {
    %c0_i32 = arith.constant 0 : i32
    %c0_i32_0 = arith.constant 0 : i32
    return %c0_i32, %arg1 : i32, i32
  }
  func.func @transform_4(%arg0: i32, %arg1: i32) -> (i32, i32) {
    %c0_i32 = arith.constant 0 : i32
    %c0_i32_0 = arith.constant 0 : i32
    return %c0_i32, %arg1 : i32, i32
  }
  func.func @transform_5(%arg0: i32, %arg1: i32) -> (i32, i32) {
    %c0_i32 = arith.constant 0 : i32
    return %arg0, %arg1 : i32, i32
  }
}

</mosaic_0001>

<bundles_post_ra>
// kernel: tpu_custom_call.1
= control target key start
LH: loop header
LB: loop body
LE: loop exit
PB: predicated region body
PF: predicated region fallthrough
CT: control target
= control target key end

     0   :  { %10 = vsyncpa [#allocation3], 0  ;;  %s375_s0 = inlined_call_operand.hbm [shape: f32[16,32], index: 0, kind: input, shape index: {}]   ;;  %s376_s1 = inlined_call_operand.vmem [shape: f32[1,32], index: 1, kind: input, shape index: {}]   ;;  %s377_s2 = inlined_call_operand.vmem [shape: f32[1,32], index: 2, kind: input, shape index: {}]   ;;  %s378_s3 = inlined_call_operand.hbm [shape: f32[32,128], index: 3, kind: input, shape index: {}]   ;;  %s379_s4 = inlined_call_operand.vmem [shape: f32[1,128], index: 4, kind: input, shape index: {}]   ;;  %s380_s5 = inlined_call_operand.hbm [shape: f32[16,128], index: 5, kind: output, shape index: {}]  }
   0x1   :  { %11 = vsyncpa [#allocation6], 0 }
   0x2   :  { %12 = vsyncpa [#allocation4], 0  ;;  %s279_s18 = smov [#allocation2]   ;;  %s207_s22 = scalar_lea.hbm %s375_s0, 256 }
   0x3   :  { %s18_s19 = sshll.u32 %s279_s18, 4  ;;  %p208_p0 = scmp.ne.s32.totalorder %s375_s0, %s207_s22  ;;  %s19_s19 = int_to_ptr.vmem [resolvable:$true] %s18_s19 }
   0x4   :  { %p211_p1 = scmp.lt.u32.totalorder %s207_s22, %s375_s0 }
   0x6   :  { %p213_p2 = pnand %p211_p1, %p208_p0 }
   0x8   :  { %216 = shalt.err (!%p213_p2)
}
   0x9   :  { %s217_s27 = scalar_lea.vmem %s19_s19, 256  ;;  %p222_p4 = scmp.lt.s32.totalorder %s19_s19, %s19_s19 }
   0xa   :  { %p218_p3 = scmp.ne.s32.totalorder %s19_s19, %s217_s27  ;;  %p223_p5 = scmp.lt.s32.totalorder %s217_s27, %s217_s27 }
   0xc   :  { %p224_p6 = por %p223_p5, %p222_p4 }
   0xe   :  { %p225_p7 = pnand %p224_p6, %p218_p3 }
  0x10   :  { %228 = shalt.err (!%p225_p7)
}
  0x11   :  { %s280_s28 = smov 128   ;;  %s281_s29 = smov 8  }
  0x12   :  { %24 = dma.hbm_to_vmem [thread:$0]  %s375_s0, 256, %s19_s19, [#allocation3], %s280_s28, %s280_s28, %s281_s29  }
  0x13   :  { %s282_s7 = smov [#allocation5]   ;;  %s229_s11 = scalar_lea.hbm %s378_s3, 512 }
  0x14   :  { %s34_s8 = sshll.u32 %s282_s7, 4  ;;  %p230_p8 = scmp.ne.s32.totalorder %s378_s3, %s229_s11  ;;  %s35_s8 = int_to_ptr.vmem [resolvable:$true] %s34_s8 }
  0x15   :  { %p233_p9 = scmp.lt.u32.totalorder %s229_s11, %s378_s3 }
  0x17   :  { %p235_p10 = pnand %p233_p9, %p230_p8 }
  0x19   :  { %238 = shalt.err (!%p235_p10)
}
  0x1a   :  { %s239_s16 = scalar_lea.vmem %s35_s8, 512  ;;  %p244_p12 = scmp.lt.s32.totalorder %s35_s8, %s35_s8 }
  0x1b   :  { %p240_p11 = scmp.ne.s32.totalorder %s35_s8, %s239_s16  ;;  %p245_p13 = scmp.lt.s32.totalorder %s239_s16, %s239_s16 }
  0x1d   :  { %p246_p0 = por %p245_p13, %p244_p12 }
  0x1f   :  { %p247_p1 = pnand %p246_p0, %p240_p11 }
  0x21   :  { %250 = shalt.err (!%p247_p1)
}
  0x22   :  { %40 = dma.hbm_to_vmem [thread:$0]  %s378_s3, 512, %s35_s8, [#allocation6], %s280_s28, %s280_s28, %s281_s29  }
  0x23   :  { %273 = dma.done.wait [#allocation3], 256  }
  0x24   :  { %274 = vsyncadd [#allocation3], 4294967040 }
  0x25   :  { %275 = dma.done.wait [#allocation6], 512  }
  0x26   :  { %276 = vsyncadd [#allocation6], 4294966784  ;;  %vm52_vm0 = vcmask 261120   ;;  %v50_v0 = vld [vmem:[#allocation2] sm:$0xff]  ;;  %v51_v1 = vld [vmem:[#allocation2 + $0x8] sm:$0xff]  ;;  %v283_v11 = vmov 0.0  }
  0x27   :  { %v53_v2 = vsel %vm52_vm0, %v50_v0, 0.0  ;;  %v59_v3 = vmul.f32 %v50_v0, %v50_v0  ;;  %v60_v4 = vmul.f32 %v51_v1, %v51_v1  ;;  %v56_v6 = vsel %vm52_vm0, %v51_v1, 0.0  ;;  %v104_v8 = vld [vmem:[#allocation5] sm:$0xff]  ;;  %v105_v9 = vld [vmem:[#allocation5 + $0x8] sm:$0xff]  ;;  %v106_v10 = vld [vmem:[#allocation5 + $0x10] sm:$0xff]  ;;  %188 = vmatprep.subr.bf16.mxu0 %v283_v11 }
  0x28   :  { %54 = vadd.xlane.f32.xlu0 %v53_v2  ;;  %v108_v12 = vpack.c.bf16 %v105_v9, %v104_v8  ;;  %v107_v13 = vld [vmem:[#allocation5 + $0x18] sm:$0xff]  ;;  %vm284_vm1 = vmmov 0   ;;  %v181_v34 = vld [vmem:[%s376_s1] ss:$0 sm:$0xff]  ;;  %s285_s1 = smov [#allocation7]  }
  0x29   :  { %v61_v5 = vsel %vm52_vm0, %v59_v3, 0.0  ;;  %v64_v7 = vsel %vm52_vm0, %v60_v4, 0.0  ;;  %192 = vmatprep.mubr.msk.bf16.mxu0 %vm284_vm1, %v283_v11  ;;  %v109_v14 = vpack.c.bf16 %v107_v13, %v106_v10  ;;  %v182_v39 = vld [vmem:[%s377_s2] ss:$0 sm:$0xff]  ;;  %s168_s23 = sshll.u32 %s285_s1, 4  ;;  %s169_s23 = int_to_ptr.vmem [resolvable:$true] %s168_s23 }
  0x2a   :  { %62 = vadd.xlane.f32.xlu1 %v61_v5  ;;  %189 = vmatpush3.bf16.msra.mxu0 %v108_v12  ;;  %v183_v44 = vld [vmem:[%s379_s4] ss:$0 sm:$0xff]  ;;  %s251_s2 = scalar_lea.vmem %s169_s23, 256  ;;  %p256_p3 = scmp.lt.s32.totalorder %s169_s23, %s169_s23 }
  0x2b   :  { %190 = vmatprep.subr.bf16.mxu0 %v283_v11  ;;  %p252_p2 = scmp.ne.s32.totalorder %s169_s23, %s251_s2  ;;  %p257_p4 = scmp.lt.s32.totalorder %s251_s2, %s251_s2 }
  0x2c   :  { %57 = vadd.xlane.f32.xlu0 %v56_v6 }
  0x2d   :  { %p258_p5 = por %p257_p4, %p256_p3 }
  0x2e   :  { %65 = vadd.xlane.f32.xlu1 %v64_v7  ;;  %191 = vmatpush3.bf16.msra.mxu0 %v109_v14 }
  0x2f   :  { %p259_p6 = pnand %p258_p5, %p252_p2 }
  0xb5   :  { %v55_v15 = vpop.xlane.xlu0 %54 }
  0xb6   :  { %v67_v16 = vmul.f32 0.03125, %v55_v15 }
  0xb7   :  { %v63_v17 = vpop.xlane.xlu1 %62 }
  0xb8   :  { %v71_v18 = vmul.f32 %v67_v16, %v67_v16  ;;  %v69_v19 = vmul.f32 0.03125, %v63_v17  ;;  %v81_v31 = vsub.f32 %v50_v0, %v67_v16 }
  0xb9   :  { %v58_v20 = vpop.xlane.xlu0 %57 }
  0xba   :  { %v73_v21 = vsub.f32 %v69_v19, %v71_v18  ;;  %v68_v22 = vmul.f32 0.03125, %v58_v20 }
  0xbb   :  { %v66_v23 = vpop.xlane.xlu1 %65 }
  0xbc   :  { %v75_v24 = vmax.f32 %v73_v21, 0.0  ;;  %v72_v25 = vmul.f32 %v68_v22, %v68_v22  ;;  %v70_v26 = vmul.f32 0.03125, %v66_v23  ;;  %v82_v35 = vsub.f32 %v51_v1, %v68_v22 }
  0xbe   :  { %v77_v27 = vadd.f32 1e-05, %v75_v24  ;;  %v74_v28 = vsub.f32 %v70_v26, %v72_v25 }
  0xc0   :  { %203 = vrsqrt.f32 %v77_v27  ;;  %v76_v29 = vmax.f32 %v74_v28, 0.0 }
  0xc2   :  { %v78_v30 = vadd.f32 1e-05, %v76_v29 }
  0xc4   :  { %205 = vrsqrt.f32 %v78_v30 }
  0xca   :  { %v204_v32 = vpop.eup %203 }
  0xcb   :  { %v83_v33 = vmul.f32 %v204_v32, %v81_v31 }
  0xcd   :  { %v92_v38 = vmul.f32 %v181_v34, %v83_v33 }
  0xce   :  { %v206_v36 = vpop.eup %205 }
  0xcf   :  { %v84_v37 = vmul.f32 %v206_v36, %v82_v35  ;;  %v101_v41 = vadd.f32 %v182_v39, %v92_v38 }
  0xd1   :  { %v93_v40 = vmul.f32 %v181_v34, %v84_v37 }
  0xd3   :  { %v102_v42 = vadd.f32 %v182_v39, %v93_v40 }
  0xd5   :  { %v103_v43 = vpack.c.bf16 %v102_v42, %v101_v41 }
  0xd7   :  { %193 = vmatmul.mubr.msk.bf16.vlgmr.msra.gmra.mrb[0].mxu0 %vm52_vm0, %v103_v43 }
 0x1aa   :  { %v154_v45 = vpop.f32.mrb[0].mxu0 }
 0x1ab   :  { %v155_v46 = vadd.f32 %v183_v44, %v154_v45  ;;  %v194_v47 = vpop.f32.mrb[1].mxu0 }
 0x1ac   :  { %v157_v48 = vpop.f32.mrb[2].mxu0 }
 0x1ad   :  { %161 = vst [vmem:[#allocation7] sm:$0xff] %v155_v46  ;;  %v158_v49 = vadd.f32 %v183_v44, %v157_v48  ;;  %v195_v50 = vpop.f32.mrb[3].mxu0 }
 0x1af   :  { %162 = vst [vmem:[#allocation7 + $0x8] sm:$0xff] %v158_v49 }
 0x1b0   :  { %262 = shalt.err (!%p259_p6)
}
 0x1b1   :  { %s263_s25 = scalar_lea.hbm %s380_s5, 256 }
 0x1b2   :  { %p264_p7 = scmp.ne.s32.totalorder %s380_s5, %s263_s25  ;;  %p267_p8 = scmp.lt.u32.totalorder %s263_s25, %s380_s5 }
 0x1b4   :  { %p269_p9 = pnand %p267_p8, %p264_p7 }
 0x1b6   :  { %272 = shalt.err (!%p269_p9)
}
 0x1b7   :  { %174 = dma.vmem_to_hbm [thread:$0]  %s169_s23, 256, %s380_s5, [#allocation4], %s280_s28, %s280_s28, %s281_s29  }
 0x1b8   :  { %277 = dma.done.wait [#allocation4], 256  }
 0x1b9   :  { %278 = vsyncadd [#allocation4], 4294967040 }
 0x1ba   :  { %178 = vsyncpa [#allocation3], 1 }
 0x1bb   :  { %179 = vsyncpa [#allocation6], 1 }
 0x1bc   :  { %180 = vsyncpa [#allocation4], 1 }

</bundles_post_ra>
